<compile_context>
chip_gen: v7x
topology: tpu7x:2x2x1
jax: 0.10.0
libtpu: 0.0.40
codegen_flags: <defaults>
</compile_context>

<pallas_src>
import jax
import jax.numpy as jnp
from jax.experimental import pallas as pl
from jax.experimental.pallas import tpu as pltpu


def _round_up(x, m):
    return ((x + m - 1) // m) * m


def _mean_weight_kernel(x_ref, w_ref, b_ref, o_ref, acc_ref):
    """Default path: out = x @ W_mean + b_mean, K-tiled, f32 accumulator.

    x_ref: [tb, tk] bf16     w_ref: [tk, F_pad] bf16
    b_ref: [1, F_pad] f32    o_ref: [tb, F_pad] f32    acc_ref: [tb, F_pad] f32
    """
    @pl.when(pl.program_id(1) == 0)
    def _():
        acc_ref[...] = jnp.zeros_like(acc_ref)

    acc_ref[...] += jnp.dot(x_ref[...], w_ref[...],
                            preferred_element_type=jnp.float32)

    @pl.when(pl.program_id(1) == pl.num_programs(1) - 1)
    def _():
        o_ref[...] = acc_ref[...] + b_ref[...]


def _per_model_kernel(x_ref, w_ref, r_ref, b_ref, o_ref, acc_ref):
    """Per-model path: acc = x @ [W_0 | W_1 | ...] (tight lane packing); the
    finalize step reduces the M lane groups with one small reduce-matmul
    (R[m*F + f, f] = 1/M), which is layout-friendly (no misaligned slices).

    x_ref: [tb, tk] bf16       w_ref: [tk, lanes] bf16 (lanes = round_up(M*F,128))
    r_ref: [lanes, F_pad] f32  b_ref: [1, F_pad] f32
    o_ref: [tb, F_pad] f32     acc_ref: [tb, lanes] f32
    """
    @pl.when(pl.program_id(1) == 0)
    def _():
        acc_ref[...] = jnp.zeros_like(acc_ref)

    acc_ref[...] += jnp.dot(x_ref[...], w_ref[...],
                            preferred_element_type=jnp.float32)

    @pl.when(pl.program_id(1) == pl.num_programs(1) - 1)
    def _():
        # MXU has plenty of slack (kernel is HBM-bound on the weight stream),
        # so this tiny [lanes, F_pad] matmul is effectively free.
        o_ref[...] = jnp.dot(acc_ref[...], r_ref[...],
                             preferred_element_type=jnp.float32) + b_ref[...]


def make_pseudo_ensemble_encoder(weights, biases, *, average_weights=True,
                                 block_b=128, block_k=512):
    """Pack ensemble weights ONCE (hoisted); return a jitted apply(x) -> [B, F].

    Args:
      weights: [M, D, F] per-model projection weights, D = C*H*W.
      biases:  [M, F]    per-model biases.
      average_weights: exploit linearity and pre-average the ensemble (default).
    """
    weights = jnp.asarray(weights, jnp.float32)   # [M, D, F]
    biases = jnp.asarray(biases, jnp.float32)     # [M, F]
    M, D, F = weights.shape

    F_pad = _round_up(F, 128)                     # lane-dense output
    block_k = min(block_k, _round_up(D, 128))     # contraction tile
    D_pad = _round_up(D, block_k)
    grid_k = D_pad // block_k

    # Hoisted mean bias (bias always averages for this ensemble), kept f32.
    b_mean = jnp.zeros((1, F_pad), jnp.float32).at[0, :F].set(
        jnp.mean(biases, axis=0))

    if average_weights:
        # mean_m(x @ W_m + b_m) == x @ mean_m(W_m) + mean_m(b_m): the kernel
        # carries no M dimension (M-fold cut in the dominant HBM weight bytes).
        lanes = F_pad
        w_eff = jnp.mean(weights, axis=0).astype(jnp.bfloat16)    # cast first
        w_packed = jnp.zeros((D_pad, lanes), jnp.bfloat16).at[:D, :F].set(w_eff)
        r_mat = None
    else:
        # Future-nonlinear path: keep every model, packed TIGHTLY along lanes
        # (total round_up(M*F, 128) lanes, not M * round_up(F, 128)).
        lanes = _round_up(M * F, 128)
        w_bf = weights.astype(jnp.bfloat16)                        # cast first
        w_cat = jnp.transpose(w_bf, (1, 0, 2)).reshape(D, M * F)
        w_packed = jnp.zeros((D_pad, lanes), jnp.bfloat16).at[:D, :M * F].set(w_cat)
        # Reduce matrix: averages lane group m back onto output lanes [0, F).
        r_mat = jnp.zeros((lanes, F_pad), jnp.float32).at[:M * F, :F].set(
            jnp.tile(jnp.eye(F, dtype=jnp.float32), (M, 1)) / M)

    def apply(x):
        B = x.shape[0]
        x_flat = jnp.reshape(x, (B, -1)).astype(jnp.bfloat16)      # cast first
        assert x_flat.shape[1] == D, "input feature size mismatch"

        tb = min(block_b, _round_up(B, 8))
        B_pad = _round_up(B, tb)
        x_p = jnp.zeros((B_pad, D_pad), jnp.bfloat16).at[:B, :D].set(x_flat)

        grid = (B_pad // tb, grid_k)

        in_specs = [
            pl.BlockSpec((tb, block_k), lambda b, k: (b, k)),      # x tile
            pl.BlockSpec((block_k, lanes), lambda b, k: (k, 0)),   # W tile
        ]
        if average_weights:
            kernel = _mean_weight_kernel
            in_specs.append(pl.BlockSpec((1, F_pad), lambda b, k: (0, 0)))
            operands = (x_p, w_packed, b_mean)
        else:
            kernel = _per_model_kernel
            in_specs.append(pl.BlockSpec((lanes, F_pad), lambda b, k: (0, 0)))
            in_specs.append(pl.BlockSpec((1, F_pad), lambda b, k: (0, 0)))
            operands = (x_p, w_packed, r_mat, b_mean)

        cost = pl.CostEstimate(
            flops=2 * B_pad * D_pad * lanes,
            transcendentals=0,
            bytes_accessed=(int(x_p.size) * 2 + int(w_packed.size) * 2
                            + B_pad * F_pad * 4),
        )

        out_p = pl.pallas_call(
            kernel,
            out_shape=jax.ShapeDtypeStruct((B_pad, F_pad), jnp.float32),
            grid_spec=pltpu.PrefetchScalarGridSpec(
                num_scalar_prefetch=0,
                grid=grid,
                in_specs=in_specs,
                out_specs=pl.BlockSpec((tb, F_pad), lambda b, k: (b, 0)),
                scratch_shapes=[pltpu.VMEM((tb, lanes), jnp.float32)],
            ),
            compiler_params=pltpu.CompilerParams(
                dimension_semantics=("parallel", "arbitrary"),
                vmem_limit_bytes=64 * 1024 * 1024,
            ),
            cost_estimate=cost,
        )(*operands)

        # Strip padding back to the logical output shape.
        return out_p[:B, :F]

    return jax.jit(apply)


if __name__ == "__main__":
    # Small, deterministic problem: 3 ensemble members, NCHW input.
    B, C, H, W = 2, 4, 16, 16
    M, F = 3, 32
    D = C * H * W

    key = jax.random.PRNGKey(0)
    kx, kw, kb = jax.random.split(key, 3)
    x = jax.random.normal(kx, (B, C, H, W), dtype=jnp.float32)
    weights = jax.random.normal(kw, (M, D, F), dtype=jnp.float32) * 0.02
    biases = jax.random.normal(kb, (M, F), dtype=jnp.float32) * 0.1

    # Pure-JAX f32 reference: mean over models of (x_flat @ W_m + b_m).
    x_flat = x.reshape(B, D)
    ref = jnp.mean(
        jnp.einsum("bd,mdf->mbf", x_flat, weights) + biases[:, None, :],
        axis=0,
    )

    # Default path: linear ensemble -> pre-averaged weights (no M in kernel).
    encoder = make_pseudo_ensemble_encoder(weights, biases, average_weights=True)
    out = jax.block_until_ready(encoder(x))
    assert out.shape == (B, F)
    # bf16 operand streaming -> small (~1e-2 relative) deviation vs f32 ref.
    assert jnp.allclose(out, ref, atol=5e-2, rtol=5e-2), "mean-weight path mismatch"

    # Flagged path: per-model tight lane packing + in-kernel model reduction.
    encoder_pm = make_pseudo_ensemble_encoder(weights, biases, average_weights=False)
    out_pm = jax.block_until_ready(encoder_pm(x))
    assert out_pm.shape == (B, F)
    assert jnp.allclose(out_pm, ref, atol=5e-2, rtol=5e-2), "per-model path mismatch"

    print("KERNEL_OK")
</pallas_src>

<mosaic_0001>
module attributes {stable_mosaic.version = 11 : i64} {
  func.func @_mean_weight_kernel(%arg0: i32, %arg1: i32, %arg2: memref<8x512xbf16, #tpu.memory_space<vmem>>, %arg3: memref<512x128xbf16, #tpu.memory_space<vmem>>, %arg4: memref<1x128xf32, #tpu.memory_space<vmem>>, %arg5: memref<8x128xf32, #tpu.memory_space<vmem>>, %arg6: memref<8x128xf32, #tpu.memory_space<vmem>>) attributes {dimension_semantics = [#tpu.dimension_semantics<parallel>, #tpu.dimension_semantics<arbitrary>], iteration_bounds = array<i64: 1, 2>, scalar_prefetch = 0 : i64, scratch_operands = 1 : i64, tpu.core_type = #tpu.core_type<tc>, window_params = [{transform_indices = @transform_0, window_bounds = array<i64: 8, 512>}, {transform_indices = @transform_1, window_bounds = array<i64: 512, 128>}, {pipeline_mode = #tpu.pipeline_mode<synchronous>, transform_indices = @transform_2, window_bounds = array<i64: 1, 128>}, {transform_indices = @transform_3, window_bounds = array<i64: 8, 128>}]} {
    %c0_i32 = arith.constant 0 : i32
    %0 = arith.cmpi eq, %arg1, %c0_i32 : i32
    %1 = arith.extui %0 : i1 to i32
    %c0_i32_0 = arith.constant 0 : i32
    %2 = arith.cmpi ne, %1, %c0_i32_0 : i32
    scf.if %2 {
      %cst_9 = arith.constant 0.000000e+00 : f32
      %12 = vector.broadcast %cst_9 : f32 to vector<8x128xf32>
      %c0_10 = arith.constant 0 : index
      %c0_11 = arith.constant 0 : index
      %13 = vector.load %arg6[%c0_10, %c0_11] : memref<8x128xf32, #tpu.memory_space<vmem>>, vector<8x128xf32>
      tpu.vector_store %arg6[%c0_10, %c0_11], %12 {strides = array<i32>} : memref<8x128xf32, #tpu.memory_space<vmem>>, vector<8x128xf32>,
    } else {
    }
    %c0 = arith.constant 0 : index
    %c0_1 = arith.constant 0 : index
    %3 = vector.load %arg6[%c0, %c0_1] : memref<8x128xf32, #tpu.memory_space<vmem>>, vector<8x128xf32>
    %c0_2 = arith.constant 0 : index
    %c0_3 = arith.constant 0 : index
    %4 = vector.load %arg2[%c0_2, %c0_3] : memref<8x512xbf16, #tpu.memory_space<vmem>>, vector<8x512xbf16>
    %c0_4 = arith.constant 0 : index
    %c0_5 = arith.constant 0 : index
    %5 = vector.load %arg3[%c0_4, %c0_5] : memref<512x128xbf16, #tpu.memory_space<vmem>>, vector<512x128xbf16>
    %cst = arith.constant dense<0.000000e+00> : vector<8x128xf32>
    %6 = tpu.matmul %4, %5, %cst {dimension_numbers = #tpu.dot_dimension_numbers<[1], [0], [0], [1], [0, 0, 1, 1], [], []>} : vector<8x512xbf16>, vector<512x128xbf16>, vector<8x128xf32> -> vector<8x128xf32>
    %7 = arith.addf %3, %6 : vector<8x128xf32>
    %c0_6 = arith.constant 0 : index
    %c0_7 = arith.constant 0 : index
    %8 = vector.load %arg6[%c0_6, %c0_7] : memref<8x128xf32, #tpu.memory_space<vmem>>, vector<8x128xf32>
    tpu.vector_store %arg6[%c0_6, %c0_7], %7 {strides = array<i32>} : memref<8x128xf32, #tpu.memory_space<vmem>>, vector<8x128xf32>,
    %c1_i32 = arith.constant 1 : i32
    %9 = arith.cmpi eq, %arg1, %c1_i32 : i32
    %10 = arith.extui %9 : i1 to i32
    %c0_i32_8 = arith.constant 0 : i32
    %11 = arith.cmpi ne, %10, %c0_i32_8 : i32
    scf.if %11 {
      %c0_9 = arith.constant 0 : index
      %c0_10 = arith.constant 0 : index
      %12 = vector.load %arg6[%c0_9, %c0_10] : memref<8x128xf32, #tpu.memory_space<vmem>>, vector<8x128xf32>
      %c0_11 = arith.constant 0 : index
      %c0_12 = arith.constant 0 : index
      %13 = vector.load %arg4[%c0_11, %c0_12] : memref<1x128xf32, #tpu.memory_space<vmem>>, vector<1x128xf32>
      %14 = vector.broadcast %13 : vector<1x128xf32> to vector<8x128xf32>
      %15 = arith.addf %12, %14 : vector<8x128xf32>
      %c0_13 = arith.constant 0 : index
      %c0_14 = arith.constant 0 : index
      %16 = vector.load %arg5[%c0_13, %c0_14] : memref<8x128xf32, #tpu.memory_space<vmem>>, vector<8x128xf32>
      tpu.vector_store %arg5[%c0_13, %c0_14], %15 {strides = array<i32>} : memref<8x128xf32, #tpu.memory_space<vmem>>, vector<8x128xf32>,
    } else {
    }
    return
  }
  func.func @transform_0(%arg0: i32, %arg1: i32) -> (i32, i32) {
    %c0_i32 = arith.constant 0 : i32
    return %arg0, %arg1 : i32, i32
  }
  func.func @transform_1(%arg0: i32, %arg1: i32) -> (i32, i32) {
    %c0_i32 = arith.constant 0 : i32
    %c0_i32_0 = arith.constant 0 : i32
    return %arg1, %c0_i32 : i32, i32
  }
  func.func @transform_2(%arg0: i32, %arg1: i32) -> (i32, i32) {
    %c0_i32 = arith.constant 0 : i32
    %c0_i32_0 = arith.constant 0 : i32
    %c0_i32_1 = arith.constant 0 : i32
    return %c0_i32, %c0_i32_0 : i32, i32
  }
  func.func @transform_3(%arg0: i32, %arg1: i32) -> (i32, i32) {
    %c0_i32 = arith.constant 0 : i32
    %c0_i32_0 = arith.constant 0 : i32
    return %arg0, %c0_i32 : i32, i32
  }
}

</mosaic_0001>

<bundles_post_ra>
// kernel: apply.1
= control target key start
LH: loop header
LB: loop body
LE: loop exit
PB: predicated region body
PF: predicated region fallthrough
CT: control target
= control target key end

     0   :  { %8 = vsyncpa [#allocation4], 0  ;;  %s1433_s0 = inlined_call_operand.hbm [shape: bf16[8,1024], index: 0, kind: input, shape index: {}]   ;;  %s1434_s1 = inlined_call_operand.hbm [shape: bf16[1024,128], index: 1, kind: input, shape index: {}]   ;;  %s1435_s2 = inlined_call_operand.hbm [shape: f32[1,128], index: 2, kind: input, shape index: {}]   ;;  %s1436_s3 = inlined_call_operand.hbm [shape: f32[8,128], index: 3, kind: output, shape index: {}]  }
   0x1   :  { %10 = vsyncpa [#allocation4 + $0x1], 0 }
   0x2   :  { %11 = vsyncpa [#allocation7], 0 }
   0x3   :  { %13 = vsyncpa [#allocation7 + $0x1], 0 }
   0x4   :  { %14 = vsyncpa [#allocation5], 0  ;;  %s1155_s12 = smov 0   ;;  %s1157_s13 = smov 0  }
   0x5   :  { %s1159_s14 = smov 0   ;;  %s1161_s15 = smov 0  }
   0x6   :  { %s1163_s16 = smov 0   ;;  %s1165_s17 = smov 0  }
   0x7 LB: > { %s1184_s18 = sadd.s32 4294967295, %s1126_s17   ;;  %s41_s19 = sadd.s32 1, %s1114_s14  ;;  %s1126_s17 = sphi %s1165_s17, %s20_s17   ;;  %s1122_s16 = sphi %s1163_s16, %s1457_s16   ;;  %s1118_s15 = sphi %s1161_s15, %s1456_s15   ;;  %s1114_s14 = sphi %s1159_s14, %s1455_s14   ;;  %s1110_s13 = sphi %s1157_s13, %s1454_s13   ;;  %s1106_s12 = sphi %s1155_s12, %s1453_s12  }
   0x8   : > { %p48_p0 = scmp.ne.s32.totalorder %s1114_s14, %s1110_s13  ;;  %p54_p1 = scmp.ne.s32.totalorder %s1110_s13, %s1106_s12 }
   0x9   : > { %p1437_p2 = scmp.eq.s32.totalorder %s1184_s18, 0  ;;  %p731_p3 = scmp.ge.s32.totalorder %s1126_s17, 1 }
   0xa   : > { %p138_p4 = scmp.lt.s32.totalorder %s1126_s17, 3  ;;  %s1128_s22 = smov [#allocation8]  }
   0xb   : > { %p1195_p5 = por %p1437_p2, %p54_p1  ;;  %s151_s23 = sshll.u32 %s1128_s22, 4  ;;  %s152_s23 = int_to_ptr.vmem [resolvable:$true] %s151_s23 }
   0xc   : > { %p1199_p6 = pnand %p731_p3, %p138_p4  ;;  %p49_p8 = scmp.eq.s32.totalorder %s1126_s17, 0 }
   0xd   : > { %s1440_s20 = scalar_select %p1195_p5, 1, 0 }
   0xe   : > { %s1441_s21 = scalar_select %p1199_p6, 1, 0 }
   0xf   : > { %p845_p7 = pneg %p1199_p6  ;;  %s29_s25 = sadd.s32 1, %s1122_s16 }
  0x10   : > { %p1213_p10 = scmp.ge.s32.totalorder %s29_s25, 2  ;;  %p1220_p11 = por %p49_p8, %p48_p0 }
  0x11   : > { %p1208_p9 = pnand %p845_p7, %p1437_p2  ;;  %s950_s30 = scalar_lea.hbm %s1435_s2, 16 }
  0x12   : > { %s1443_s26 = scalar_select %p1213_p10, 1, 0 }
  0x13   : > { %s1444_s27 = scalar_select %p1220_p11, 1, 0 }
  0x14   : > { %p951_p13 = scmp.ne.s32.totalorder %s1435_s2, %s950_s30  ;;  %p952_p1 = pneg %p1208_p9 }
  0x15   : > { %p957_p0 = scmp.lt.u32.totalorder %s950_s30, %s1435_s2 }
  0x16   : > { %p953_p3 = pnand %p952_p1, %p951_p13 }
  0x18   : > { %p954_p4 = pneg %p953_p3 }
  0x1a   : > { %p959_p7 = pnand %p957_p0, %p954_p4 }
  0x1c   : > { %962 = shalt.err (!%p959_p7)
}
  0x1d   : > { %s963_s8 = scalar_lea.vmem %s152_s23, 16  ;;  %s970_s9 = scalar_lea.vmem %s152_s23, 32 }
  0x1e   : > { %p964_p8 = scmp.ne.s32.totalorder %s152_s23, %s963_s8  ;;  %p971_p5 = scmp.lt.s32.totalorder %s152_s23, %s152_s23 }
  0x1f   : > { %p972_p6 = scmp.lt.s32.totalorder %s970_s9, %s963_s8 }
  0x20   : > { %p966_p2 = pnand %p964_p8, %p952_p1 }
  0x21   : > { %p973_p11 = por %p972_p6, %p971_p5 }
  0x22   : > { %p967_p12 = pneg %p966_p2 }
  0x24   : > { %p974_p10 = pnand %p973_p11, %p967_p12 }
  0x26   : > { %977 = shalt.err (!%p974_p10)
}
  0x27   : > { %848 = dma.hbm_to_vmem [thread:$0]  (!%p1208_p9), %s1435_s2, 16, %s152_s23, [#allocation7]  }
  0x28   : > { %p1445_p2 = scmp.ne.s32.totalorder %s1443_s26, 0  ;;  %s1246_s12 = sand.u32 1, %s1114_s14  }
  0x29   : > { %s787_s22 = sshll.u32 %s1122_s16, 8  ;;  %s734_s28 = sshll.u32 %s1246_s12, 4 }
  0x2a   : > { %s1459_s25 = smov (%p1445_p2, %s29_s25), 0  ;;  %s1255_s4 = scalar_lea.hbm %s1433_s0, %s787_s22 }
  0x2b   : > { %s37_s24 = ssub.s32 %s1122_s16, %s1459_s25  ;;  %s166_s26 = scalar_lea.vmem [#allocation3], %s734_s28 }
  0x2c   : > { %p39_p5 = scmp.eq.s32.totalorder %s37_s24, 0  ;;  %s176_s5 = sshll.u32 %s166_s26, 4  ;;  %s1270_s5 = int_to_ptr.vmem [resolvable:$true] %s176_s5 }
  0x2d   : > { %p1446_p6 = scmp.ne.s32.totalorder %s1444_s27, 0  ;;  %p1447_p9 = scmp.lt.s32.totalorder %s1126_s17, 2 }
  0x2e   : > { %s1260_s23 = scalar_select %p39_p5, %s1114_s14, %s41_s19  }
  0x2f   : > { %p1266_p10 = pnand %p1447_p9, %p1446_p6  ;;  %s737_s7 = sshll.u32 %s1246_s12, 8 }
  0x30   : > { %s163_s8 = scalar_lea.sflag [#allocation4], %s1246_s12  ;;  %s978_s9 = scalar_lea.hbm %s1255_s4, 256 }
  0x31   : > { %p979_p11 = scmp.ne.s32.totalorder %s1255_s4, %s978_s9  ;;  %p980_p12 = pneg %p1266_p10 }
  0x32   : > { %s983_s10 = scalar_lea.hbm %s1433_s0, 512  ;;  %p984_p3 = scmp.lt.u32.totalorder %s1255_s4, %s1433_s0 }
  0x33   : > { %p981_p13 = pnand %p980_p12, %p979_p11  ;;  %p985_p4 = scmp.lt.u32.totalorder %s983_s10, %s978_s9 }
  0x34   : > { %p987_p7 = scmp.lt.u32.totalorder %s978_s9, %s1255_s4 }
  0x35   : > { %p982_p1 = pneg %p981_p13  ;;  %p986_p0 = por %p985_p4, %p984_p3 }
  0x37   : > { %p988_p8 = por %p987_p7, %p986_p0 }
  0x39   : > { %p989_p2 = pnand %p988_p8, %p982_p1 }
  0x3b   : > { %992 = shalt.err (!%p989_p2)
}
  0x3c   : > { %s993_s24 = scalar_lea.vmem %s1270_s5, 256  ;;  %s1129_s28 = smov [#allocation3]  }
  0x3d   : > { %p994_p5 = scmp.ne.s32.totalorder %s1270_s5, %s993_s24  ;;  %s998_s29 = sshll.u32 %s1129_s28, 4  ;;  %s999_s29 = int_to_ptr.vmem [resolvable:$false] %s998_s29 }
  0x3e   : > { %s1000_s30 = scalar_lea.vmem %s999_s29, 512  ;;  %p1001_p11 = scmp.lt.s32.totalorder %s1270_s5, %s999_s29 }
  0x3f   : > { %p996_p6 = pnand %p994_p5, %p980_p12  ;;  %p1002_p13 = scmp.lt.s32.totalorder %s1000_s30, %s993_s24 }
  0x41   : > { %p997_p9 = pneg %p996_p6  ;;  %p1003_p3 = por %p1002_p13, %p1001_p11 }
  0x43   : > { %p1004_p4 = pnand %p1003_p3, %p997_p9 }
  0x45   : > { %1007 = shalt.err (!%p1004_p4)
}
  0x46   : > { %852 = dma.hbm_to_vmem [thread:$0]  (!%p1266_p10), %s1255_s4, 256, %s1270_s5, %s163_s8  }
  0x47   : > { %s788_s26 = sshll.u32 %s1122_s16, 12  ;;  %s187_s9 = scalar_lea.vmem [#allocation6], %s737_s7 }
  0x48   : > { %s194_s19 = sshll.u32 %s187_s9, 4  ;;  %s183_s27 = sand.u32 1, %s1126_s17   ;;  %s1302_s19 = int_to_ptr.vmem [resolvable:$true] %s194_s19 }
  0x49   : > { %s1308_s22 = scalar_lea.hbm %s1434_s1, %s788_s26  ;;  %s1310_s24 = scalar_lea.sflag [#allocation7], %s183_s27 }
  0x4a   : > { %s1008_s28 = scalar_lea.hbm %s1308_s22, 4096  ;;  %s1013_s5 = scalar_lea.hbm %s1434_s1, 8192 }
  0x4b   : > { %p1009_p1 = scmp.ne.s32.totalorder %s1308_s22, %s1008_s28  ;;  %p1014_p8 = scmp.lt.u32.totalorder %s1308_s22, %s1434_s1 }
  0x4c   : > { %p1015_p2 = scmp.lt.u32.totalorder %s1013_s5, %s1008_s28  ;;  %p1017_p6 = scmp.lt.u32.totalorder %s1008_s28, %s1308_s22 }
  0x4d   : > { %p1011_p0 = pnand %p1009_p1, %p980_p12 }
  0x4e   : > { %p1016_p5 = por %p1015_p2, %p1014_p8 }
  0x4f   : > { %p1012_p7 = pneg %p1011_p0 }
  0x50   : > { %p1018_p9 = por %p1017_p6, %p1016_p5 }
  0x52   : > { %p1019_p11 = pnand %p1018_p9, %p1012_p7 }
  0x54   : > { %1022 = shalt.err (!%p1019_p11)
}
  0x55   : > { %s1023_s29 = scalar_lea.vmem %s1302_s19, 4096  ;;  %s1130_s30 = smov [#allocation6]  }
  0x56   : > { %p1024_p13 = scmp.ne.s32.totalorder %s1302_s19, %s1023_s29  ;;  %s1028_s26 = sshll.u32 %s1130_s30, 4  ;;  %s1029_s26 = int_to_ptr.vmem [resolvable:$false] %s1028_s26 }
  0x57   : > { %s1030_s9 = scalar_lea.vmem %s1029_s26, 8192  ;;  %p1031_p1 = scmp.lt.s32.totalorder %s1302_s19, %s1029_s26 }
  0x58   : > { %p1026_p3 = pnand %p1024_p13, %p980_p12  ;;  %p1032_p0 = scmp.lt.s32.totalorder %s1030_s9, %s1023_s29 }
  0x5a   : > { %p1027_p4 = pneg %p1026_p3  ;;  %p1033_p8 = por %p1032_p0, %p1031_p1 }
  0x5c   : > { %p1034_p2 = pnand %p1033_p8, %p1027_p4 }
  0x5e   : > { %1037 = shalt.err (!%p1034_p2)
}
  0x5f   : > { %s1131_s27 = smov 64   ;;  %s1132_s10 = smov 4  }
  0x60   : > { %855 = dma.hbm_to_vmem [thread:$0]  (!%p1266_p10), %s1308_s22, 4096, %s1302_s19, %s1310_s24, %s1131_s27, %s1131_s27, %s1132_s10  }
  0x61   : > { %p1449_p12 = scmp.ne.s32.totalorder %s1441_s21, 0 }
  0x62   : > { %s208_s11 = sand.u32 (!%p1449_p12), 1, %s1110_s13   ;;  %p1450_p7 = scmp.ne.s32.totalorder (!%p1449_p12), %s1440_s20, 0 }
  0x63   : > { %206 = sbr.rel (%p1449_p12) target bundleno = 412 (0x19c), region = 32  ;;  %s741_s28 = sshll.u32 (!%p1449_p12), %s208_s11, 4 }
  0x64   : > { %s209_s12 = scalar_lea.sflag (!%p1449_p12), [#allocation4], %s208_s11  ;;  %s1339_s4 = scalar_lea.vmem (!%p1449_p12), [#allocation3], %s741_s28 }
  0x6a   : > { %1089 = dma.done.wait (%p1450_p7), %s209_s12, 256  }
  0x6b   : > { %1091 = vsyncadd (%p1450_p7), %s209_s12, 4294967040  ;;  %s217_s5 = sand.u32 1, %s1184_s18   ;;  %s742_s6 = sshll.u32 %s208_s11, 8 }
  0x6c   : > { %s218_s19 = scalar_lea.sflag [#allocation7], %s217_s5  ;;  %s1346_s22 = scalar_lea.vmem [#allocation6], %s742_s6 }
  0x6d   : > { %1093 = dma.done.wait (%p1450_p7), %s218_s19, 4096  }
  0x6e   : > { %1095 = vsyncadd (%p1450_p7), %s218_s19, 4294963200  ;;  %p1451_p10 = scmp.eq.s32.totalorder %s1184_s18, 0 }
  0x70   : > { %1097 = dma.done.wait (%p1451_p10), [#allocation7], 16   ;;  %p1452_p5 = pmov %p1451_p10 }
  0x71   : > { %p744_p6 = scmp.ne.s32.totalorder %s1118_s15, 0 }
  0x72   : > { %1099 = vsyncadd (%p1452_p5), [#allocation7], 4294967280  ;;  %v1133_v0 = vmov (!%p744_p6), 0.0  }
  0x73   : > { %254 = sbr.rel (%p744_p6) target bundleno = 122 (0x7a), region = 48  ;;  %255 = vst [vmem:[#allocation2] sm:$0xff] (!%p744_p6), %v1133_v0 }
  0x7a PF: > { %v914_v1 = vld [vmem:[%s1346_s22 + $0x40] sm:$0xff]   ;;  %v918_v5 = vld [vmem:[%s1346_s22 + $0x48] sm:$0xff]   ;;  %v922_v9 = vld [vmem:[%s1346_s22 + $0x50] sm:$0xff]   ;;  %p781_p9 = scmp.ne.s32.totalorder %s1118_s15, 1 }
  0x7b   : > { %v915_v2 = vld [vmem:[%s1346_s22 + $0xc0] sm:$0xff]   ;;  %789 = vmatprep.subr.bf16.mxu0 %v914_v1  ;;  %v919_v6 = vld [vmem:[%s1346_s22 + $0xc8] sm:$0xff]   ;;  %v923_v10 = vld [vmem:[%s1346_s22 + $0xd0] sm:$0xff]  }
  0x7c   : > { %v916_v3 = vld [vmem:[%s1346_s22] sm:$0xff]   ;;  %811 = vmatprep.subr.bf16.mxu1 %v915_v2  ;;  %v920_v7 = vld [vmem:[%s1346_s22 + $0x8] sm:$0xff]   ;;  %v924_v11 = vld [vmem:[%s1346_s22 + $0x10] sm:$0xff]  }
  0x7d   : > { %v917_v4 = vld [vmem:[%s1346_s22 + $0x80] sm:$0xff]   ;;  %790 = vmatpush3.bf16.msra.mxu0 %v916_v3  ;;  %v921_v8 = vld [vmem:[%s1346_s22 + $0x88] sm:$0xff]   ;;  %v925_v12 = vld [vmem:[%s1346_s22 + $0x90] sm:$0xff]  }
  0x7e   : > { %812 = vmatpush3.bf16.msra.mxu1 %v917_v4  ;;  %791 = vmatprep.subr.bf16.mxu0 %v918_v5  ;;  %v926_v13 = vld [vmem:[%s1346_s22 + $0x58] sm:$0xff]   ;;  %v930_v17 = vld [vmem:[%s1346_s22 + $0x60] sm:$0xff]   ;;  %v934_v21 = vld [vmem:[%s1346_s22 + $0x68] sm:$0xff]  }
  0x7f   : > { %813 = vmatprep.subr.bf16.mxu1 %v919_v6  ;;  %v927_v14 = vld [vmem:[%s1346_s22 + $0xd8] sm:$0xff]   ;;  %v931_v18 = vld [vmem:[%s1346_s22 + $0xe0] sm:$0xff]   ;;  %v935_v22 = vld [vmem:[%s1346_s22 + $0xe8] sm:$0xff]  }
  0x80   : > { %v928_v15 = vld [vmem:[%s1346_s22 + $0x18] sm:$0xff]   ;;  %v932_v19 = vld [vmem:[%s1346_s22 + $0x20] sm:$0xff]   ;;  %v936_v23 = vld [vmem:[%s1346_s22 + $0x28] sm:$0xff]  }
  0x81   : > { %792 = vmatpush3.bf16.msra.mxu0 %v920_v7  ;;  %v929_v16 = vld [vmem:[%s1346_s22 + $0x98] sm:$0xff]   ;;  %v933_v20 = vld [vmem:[%s1346_s22 + $0xa0] sm:$0xff]   ;;  %v937_v24 = vld [vmem:[%s1346_s22 + $0xa8] sm:$0xff]  }
  0x82   : > { %814 = vmatpush3.bf16.msra.mxu1 %v921_v8  ;;  %793 = vmatprep.subr.bf16.mxu0 %v922_v9  ;;  %v938_v25 = vld [vmem:[%s1346_s22 + $0x70] sm:$0xff]   ;;  %v942_v29 = vld [vmem:[%s1346_s22 + $0x78] sm:$0xff]   ;;  %v782_v53 = vld [vmem:[#allocation8] ss:$0 sm:$0xff] (!%p781_p9) }
  0x83   : > { %815 = vmatprep.subr.bf16.mxu1 %v923_v10  ;;  %v939_v26 = vld [vmem:[%s1346_s22 + $0xf0] sm:$0xff]   ;;  %v943_v30 = vld [vmem:[%s1346_s22 + $0xf8] sm:$0xff]  }
  0x84   : > { %v940_v27 = vld [vmem:[%s1346_s22 + $0x30] sm:$0xff]   ;;  %v944_v31 = vld [vmem:[%s1346_s22 + $0x38] sm:$0xff]  }
  0x85   : > { %794 = vmatpush3.bf16.msra.mxu0 %v924_v11  ;;  %v941_v28 = vld [vmem:[%s1346_s22 + $0xb0] sm:$0xff]   ;;  %v945_v32 = vld [vmem:[%s1346_s22 + $0xb8] sm:$0xff]  }
  0x86   : > { %816 = vmatpush3.bf16.msra.mxu1 %v925_v12  ;;  %795 = vmatprep.subr.bf16.mxu0 %v926_v13  ;;  %v257_v33 = vld [vmem:[%s1339_s4] sm:$0xff]  ;;  %v258_v34 = vld [vmem:[%s1339_s4 + $0x8] sm:$0xff] }
  0x87   : > { %817 = vmatprep.subr.bf16.mxu1 %v927_v14  ;;  %v745_v35 = vcombine.low %v257_v33, %v257_v33  ;;  %v746_v36 = vcombine.high %v257_v33, %v257_v33  ;;  %v747_v37 = vcombine.low %v258_v34, %v258_v34  ;;  %v748_v38 = vcombine.high %v258_v34, %v258_v34  ;;  %v256_v47 = vld [vmem:[#allocation2] sm:$0xff] }
  0x89   : > { %796 = vmatpush3.bf16.msra.mxu0 %v928_v15  ;;  %561 = vmatprep.mubr.bf16.mxu0 %v746_v36 }
  0x8a   : > { %818 = vmatpush3.bf16.msra.mxu1 %v929_v16  ;;  %797 = vmatprep.subr.bf16.mxu0 %v930_v17 }
  0x8b   : > { %819 = vmatprep.subr.bf16.mxu1 %v931_v18  ;;  %601 = vmatprep.mubr.bf16.mxu1 %v748_v38 }
  0x8d   : > { %798 = vmatpush3.bf16.msra.mxu0 %v932_v19 }
  0x8e   : > { %820 = vmatpush3.bf16.msra.mxu1 %v933_v20  ;;  %799 = vmatprep.subr.bf16.mxu0 %v934_v21 }
  0x8f   : > { %821 = vmatprep.subr.bf16.mxu1 %v935_v22 }
  0x91   : > { %800 = vmatpush3.bf16.msra.mxu0 %v936_v23 }
  0x92   : > { %822 = vmatpush3.bf16.msra.mxu1 %v937_v24  ;;  %801 = vmatprep.subr.bf16.mxu0 %v938_v25 }
  0x93   : > { %823 = vmatprep.subr.bf16.mxu1 %v939_v26 }
  0x95   : > { %802 = vmatpush3.bf16.msra.mxu0 %v940_v27 }
  0x96   : > { %824 = vmatpush3.bf16.msra.mxu1 %v941_v28  ;;  %803 = vmatprep.subr.bf16.mxu0 %v942_v29 }
  0x97   : > { %825 = vmatprep.subr.bf16.mxu1 %v943_v30 }
  0x99   : > { %804 = vmatpush3.bf16.msra.mxu0 %v944_v31 }
  0x9a   : > { %826 = vmatpush3.bf16.msra.mxu1 %v945_v32 }
  0x9c   : > { %562 = vmatmul.mubr.bf16.vlgmr.msra.gmra.mrb[0].mxu0 %v745_v35 }
  0x9d   : > { %602 = vmatmul.mubr.bf16.vlgmr.msra.gmra.mrb[0].mxu1 %v747_v37 }
 0x16f   : > { %v805_v39 = vpop.f32.mrb[0].mxu0 }
 0x170   : > { %v827_v40 = vpop.f32.mrb[0].mxu1  ;;  %v806_v41 = vpop.f32.mrb[1].mxu0 }
 0x171   : > { %v828_v42 = vpop.f32.mrb[1].mxu1  ;;  %v807_v43 = vadd.f32 %v806_v41, %v805_v39  ;;  %v808_v45 = vpop.f32.mrb[2].mxu0 }
 0x172   : > { %v829_v44 = vadd.f32 %v828_v42, %v827_v40  ;;  %v830_v46 = vpop.f32.mrb[2].mxu1  ;;  %v809_v48 = vpop.f32.mrb[3].mxu0  ;;  %614 = sbr.rel (%p781_p9) target bundleno = 387 (0x183), region = 52 }
 0x173   : > { %v831_v49 = vpop.f32.mrb[3].mxu1 }
 0x174   : > { %v604_v50 = vadd.f32 %v829_v44, %v807_v43 }
 0x176   : > { %v609_v51 = vadd.f32 %v604_v50, %v256_v47 }
 0x178   : > { %610 = vst [vmem:[#allocation2] sm:$0xff] %v609_v51 }
 0x17f   : > { %v615_v52 = vld [vmem:[#allocation2] sm:$0xff] }
 0x180   : > { %v623_v54 = vadd.f32 %v782_v53, %v615_v52 }
 0x182   : > { %624 = vst [vmem:[#allocation9] sm:$0xff] %v623_v54 }
 0x183 PF: > { %p859_p11 = scmp.eq.s32.totalorder %s1184_s18, 1  ;;  %s1134_s20 = smov [#allocation9]  }
 0x184   : > { %s634_s21 = sshll.u32 %s1134_s20, 4  ;;  %s635_s21 = int_to_ptr.vmem [resolvable:$true] %s634_s21 }
 0x185   : > { %s1038_s24 = scalar_lea.vmem %s635_s21, 128  ;;  %p1045_p1 = scmp.lt.s32.totalorder %s635_s21, %s635_s21 }
 0x186   : > { %p1039_p13 = scmp.ne.s32.totalorder %s635_s21, %s1038_s24  ;;  %p1046_p0 = scmp.lt.s32.totalorder %s1038_s24, %s1038_s24 }
 0x188   : > { %p1040_p3 = pnand %p1039_p13, %p859_p11  ;;  %p1047_p8 = por %p1046_p0, %p1045_p1 }
 0x18a   : > { %p1041_p4 = pneg %p1040_p3 }
 0x18c   : > { %p1048_p2 = pnand %p1047_p8, %p1041_p4 }
 0x18e   : > { %1051 = shalt.err (!%p1048_p2)
}
 0x18f   : > { %s1052_s8 = scalar_lea.hbm %s1436_s3, 128 }
 0x190   : > { %p1053_p12 = scmp.ne.s32.totalorder %s1436_s3, %s1052_s8  ;;  %p1058_p5 = scmp.lt.u32.totalorder %s1052_s8, %s1436_s3 }
 0x192   : > { %p1054_p7 = pnand %p1053_p12, %p859_p11 }
 0x194   : > { %p1055_p10 = pneg %p1054_p7 }
 0x196   : > { %p1060_p6 = pnand %p1058_p5, %p1055_p10 }
 0x198   : > { %1063 = shalt.err (!%p1060_p6)
}
 0x199   : > { %842 = dma.vmem_to_hbm [thread:$0]  (%p859_p11), %s635_s21, 128, %s1436_s3, [#allocation5]  }
 0x19a   : > { %1101 = dma.done.wait (%p859_p11), [#allocation5], 128  }
 0x19b   : > { %1103 = vsyncadd (%p859_p11), [#allocation5], 4294967168 }
 0x19c PF: > { %s20_s17 = sadd.s32 1, %s1126_s17   ;;  %s1453_s12 = smov %s1110_s13 }
 0x19d   : > { %p17_p9 = scmp.ge.s32.totalorder %s20_s17, 4   ;;  %s1454_s13 = smov %s1114_s14 }
 0x19e   : > { %s1455_s14 = smov %s1260_s23  ;;  %s1456_s15 = smov %s1122_s16 }
 0x19f   : > { %s1457_s16 = smov %s1459_s25  ;;  %19 = sbr.rel (!%p17_p9) target bundleno = 7 (0x7), region = 95 }
 0x1a6   :  { %647 = vsyncpa [#allocation4], 1 }
 0x1a7   :  { %649 = vsyncpa [#allocation4 + $0x1], 1 }
 0x1a8   :  { %650 = vsyncpa [#allocation7], 1 }
 0x1a9   :  { %652 = vsyncpa [#allocation7 + $0x1], 1 }
 0x1aa   :  { %653 = vsyncpa [#allocation5], 1 }
 0x1ab   :  { %655 = vsyncpa [#allocation5 + $0x1], 1 }

</bundles_post_ra>
